<compile_context>
chip_gen: v7x
topology: tpu7x:2x2x1
jax: 0.10.0
libtpu: 0.0.40
codegen_flags: <defaults>
</compile_context>

<pallas_src>
import math
import functools

import jax
import jax.numpy as jnp
from jax.experimental import pallas as pl
from jax.experimental.pallas import tpu as pltpu


def _readout_kernel(x_ref, w_ref, b_ref, o_ref, *, beta: float):
    # x_ref: (Bt, Cin, TILE_L)   w_ref: (Cout, Cin)
    # b_ref: (Cout, 1)           o_ref: (Bt, Cout, TILE_L)
    w = w_ref[...]                       # resident across the grid
    b = b_ref[...]
    bt = x_ref.shape[0]
    for i in range(bt):                  # small static unroll over batch rows
        x = x_ref[i]                     # (Cin, TILE_L), L on the lane axis
        # Block-diagonal dense matmul == grouped 1x1 conv (single MXU pass).
        y = jnp.dot(w, x, preferred_element_type=jnp.float32) + b   # (Cout, TILE_L)
        # PyTorch Softplus(beta, threshold=20):
        #   out = y                        if beta*y > 20
        #       = log1p(exp(beta*y))/beta  otherwise
        z = beta * y
        sp = jnp.where(z > 20.0, y, jnp.log1p(jnp.exp(jnp.minimum(z, 20.0))) / beta)
        o_ref[i] = sp.astype(o_ref.dtype)


def _choose_tiles(B, Cin, Cout, L, *, target_bytes=1 << 20,
                  vmem_budget=24 << 20, max_bt=8, max_tile_l=8192):
    """Pick (Bt, TILE_L).

    TILE_L is the full L extent when L is small (full-dim blocks are always
    legal), otherwise a multiple of 128 bounded by the VMEM budget.  Bt grows
    until ~target_bytes of x move per step.  Budget assumes double-buffered
    x + out blocks (safe on v7x's 64 MiB physical VMEM)."""
    bytes_per_col = (Cin + Cout) * 4                    # x + out, per batch row, per L column

    if L <= 1024:
        tile_l = L
    else:
        max_l = (vmem_budget // (2 * bytes_per_col)) // 128 * 128   # Bt=1, double-buffered
        tile_l = int(max(128, min(max_l, max_tile_l)))
    num_lt = pl.cdiv(L, tile_l)

    bt = 1
    while (bt < min(B, max_bt)
           and bt * Cin * tile_l * 4 < target_bytes
           and 2 * (bt + 1) * bytes_per_col * tile_l <= vmem_budget):
        bt += 1

    # v7x has 2 TensorCores: keep >= 2 parallel grid steps when B*L allows it.
    if num_lt * pl.cdiv(B, bt) < 2 and B >= 2:
        bt = max(1, B // 2)
    return bt, tile_l


def readout_forward(x, weight, bias, *, out_features: int, groups: int,
                    softplus_beta: float = 1.0,
                    bt: int | None = None, tile_l: int | None = None):
    """x: (B, Cin, L) float32 (NCL, native PyTorch layout).
    weight: (Cout_pad, Cin//groups)  (Conv1d weight with the k=1 axis squeezed).
    bias:   (Cout_pad,).
    Returns (B, out_features, L)."""
    B, Cin, L = x.shape
    Cout_pad = weight.shape[0]
    assert Cin % groups == 0 and Cout_pad % groups == 0
    Cin_g = Cin // groups
    Cout_g = Cout_pad // groups
    assert weight.shape[1] == Cin_g

    # Fold the grouped conv into one block-diagonal dense weight and drop the
    # padded output rows up front (tiny, one-time): the kernel then writes the
    # final (B, out_features, L) with no post-kernel slice.
    w_g = weight.reshape(groups, Cout_g, Cin_g)
    eye = jnp.eye(groups, dtype=weight.dtype)
    w_dense = jnp.einsum("goc,gh->gohc", w_g, eye).reshape(Cout_pad, Cin)[:out_features]
    b_dense = bias[:out_features].reshape(out_features, 1)

    auto_bt, auto_tl = _choose_tiles(B, Cin, out_features, L)
    BT = auto_bt if bt is None else bt
    TILE_L = auto_tl if tile_l is None else tile_l

    kernel = functools.partial(_readout_kernel, beta=float(softplus_beta))

    # NOTE: if upstream activations are bf16, pass them through unchanged
    # (do NOT cast in the wrapper) -- the kernel accumulates in f32 regardless.
    return pl.pallas_call(
        kernel,
        out_shape=jax.ShapeDtypeStruct((B, out_features, L), x.dtype),
        grid_spec=pl.GridSpec(
            grid=(pl.cdiv(B, BT), pl.cdiv(L, TILE_L)),
            in_specs=[
                pl.BlockSpec((BT, Cin, TILE_L), lambda b, l: (b, 0, l)),
                pl.BlockSpec((out_features, Cin), lambda b, l: (0, 0)),
                pl.BlockSpec((out_features, 1), lambda b, l: (0, 0)),
            ],
            out_specs=pl.BlockSpec((BT, out_features, TILE_L),
                                   lambda b, l: (b, 0, l)),
        ),
        compiler_params=pltpu.CompilerParams(
            dimension_semantics=("parallel", "parallel"),
            vmem_limit_bytes=32 * 1024 * 1024,
        ),
    )(x, w_dense, b_dense)


def _reference(x, weight, bias, *, out_features, groups, softplus_beta):
    """Pure-JAX reference matching the PyTorch module."""
    B, Cin, L = x.shape
    Cout_pad = weight.shape[0]
    Cin_g = Cin // groups
    Cout_g = Cout_pad // groups
    xg = x.reshape(B, groups, Cin_g, L)
    wg = weight.reshape(groups, Cout_g, Cin_g)
    y = jnp.einsum("goc,bgcl->bgol", wg, xg) + bias.reshape(groups, Cout_g, 1)
    y = y.reshape(B, Cout_pad, L)[:, :out_features]
    beta = softplus_beta
    z = beta * y
    return jnp.where(z > 20.0, y, jnp.log1p(jnp.exp(jnp.minimum(z, 20.0))) / beta)


if __name__ == "__main__":
    # Small shapes consistent with the module's forward (Conv1d -> NCL input).
    B, Cin, L = 2, 32, 256
    out_features = 11
    groups = 2
    softplus_beta = 1.5
    Cout_pad = math.ceil(out_features / groups) * groups   # = 12

    key = jax.random.PRNGKey(0)
    kx, kw, kb = jax.random.split(key, 3)
    x = jax.random.normal(kx, (B, Cin, L), dtype=jnp.float32)
    # Deterministic synthetic parameters (Conv1d weight with k=1 squeezed).
    weight = 0.1 * jax.random.normal(kw, (Cout_pad, Cin // groups), dtype=jnp.float32)
    bias = 0.1 * jax.random.normal(kb, (Cout_pad,), dtype=jnp.float32)

    # TODO(synk): Dropout1d(p=drop_rate) is identity at inference; no kernel needed.

    y = readout_forward(x, weight, bias, out_features=out_features,
                        groups=groups, softplus_beta=softplus_beta)
    y = jax.block_until_ready(y)

    y_ref = _reference(x, weight, bias, out_features=out_features,
                       groups=groups, softplus_beta=softplus_beta)
    assert y.shape == (B, out_features, L)
    assert jnp.allclose(y, y_ref, atol=1e-5, rtol=1e-5)

    print("KERNEL_OK")
</pallas_src>

<mosaic_0001>
module attributes {stable_mosaic.version = 11 : i64} {
  func.func @_readout_kernel(%arg0: i32, %arg1: i32, %arg2: memref<1x32x256xf32, #tpu.memory_space<vmem>>, %arg3: memref<11x32xf32, #tpu.memory_space<vmem>>, %arg4: memref<11x1xf32, #tpu.memory_space<vmem>>, %arg5: memref<1x11x256xf32, #tpu.memory_space<vmem>>) attributes {dimension_semantics = [#tpu.dimension_semantics<parallel>, #tpu.dimension_semantics<parallel>], iteration_bounds = array<i64: 2, 1>, scalar_prefetch = 0 : i64, scratch_operands = 0 : i64, tpu.core_type = #tpu.core_type<tc>, window_params = [{transform_indices = @transform_0, window_bounds = array<i64: 1, 32, 256>}, {pipeline_mode = #tpu.pipeline_mode<synchronous>, transform_indices = @transform_1, window_bounds = array<i64: 11, 32>}, {pipeline_mode = #tpu.pipeline_mode<synchronous>, transform_indices = @transform_2, window_bounds = array<i64: 11, 1>}, {transform_indices = @transform_3, window_bounds = array<i64: 1, 11, 256>}]} {
    %c0 = arith.constant 0 : index
    %c0_0 = arith.constant 0 : index
    %0 = vector.load %arg3[%c0, %c0_0] : memref<11x32xf32, #tpu.memory_space<vmem>>, vector<11x32xf32>
    %c0_1 = arith.constant 0 : index
    %c0_2 = arith.constant 0 : index
    %1 = vector.load %arg4[%c0_1, %c0_2] : memref<11x1xf32, #tpu.memory_space<vmem>>, vector<11x1xf32>
    %c0_3 = arith.constant 0 : index
    %c0_4 = arith.constant 0 : index
    %c0_5 = arith.constant 0 : index
    %2 = vector.load %arg2[%c0_3, %c0_4, %c0_5] : memref<1x32x256xf32, #tpu.memory_space<vmem>>, vector<1x32x256xf32>
    %3 = vector.shape_cast %2 : vector<1x32x256xf32> to vector<32x256xf32>
    %cst = arith.constant dense<0.000000e+00> : vector<11x256xf32>
    %4 = tpu.matmul %0, %3, %cst {dimension_numbers = #tpu.dot_dimension_numbers<[1], [0], [0], [1], [0, 0, 1, 1], [], []>} : vector<11x32xf32>, vector<32x256xf32>, vector<11x256xf32> -> vector<11x256xf32>
    %5 = vector.broadcast %1 : vector<11x1xf32> to vector<11x256xf32>
    %6 = arith.addf %4, %5 : vector<11x256xf32>
    %cst_6 = arith.constant 1.500000e+00 : f32
    %7 = vector.broadcast %cst_6 : f32 to vector<11x256xf32>
    %8 = arith.mulf %7, %6 : vector<11x256xf32>
    %cst_7 = arith.constant 2.000000e+01 : f32
    %9 = vector.broadcast %cst_7 : f32 to vector<11x256xf32>
    %10 = arith.cmpf ogt, %8, %9 : vector<11x256xf32>
    %cst_8 = arith.constant 2.000000e+01 : f32
    %11 = vector.broadcast %cst_8 : f32 to vector<11x256xf32>
    %12 = arith.minimumf %8, %11 : vector<11x256xf32>
    %13 = math.exp %12 : vector<11x256xf32>
    %14 = math.log1p %13 : vector<11x256xf32>
    %cst_9 = arith.constant 1.500000e+00 : f32
    %15 = vector.broadcast %cst_9 : f32 to vector<11x256xf32>
    %16 = arith.divf %14, %15 : vector<11x256xf32>
    %17 = arith.select %10, %6, %16 : vector<11x256xi1>, vector<11x256xf32>
    %c0_10 = arith.constant 0 : index
    %c0_11 = arith.constant 0 : index
    %c0_12 = arith.constant 0 : index
    %18 = vector.load %arg5[%c0_10, %c0_11, %c0_12] : memref<1x11x256xf32, #tpu.memory_space<vmem>>, vector<1x11x256xf32>
    %19 = vector.shape_cast %18 : vector<1x11x256xf32> to vector<11x256xf32>
    %20 = vector.shape_cast %17 : vector<11x256xf32> to vector<1x11x256xf32>
    tpu.vector_store %arg5[%c0_10, %c0_11, %c0_12], %20 {strides = array<i32>} : memref<1x11x256xf32, #tpu.memory_space<vmem>>, vector<1x11x256xf32>,
    return
  }
  func.func @transform_0(%arg0: i32, %arg1: i32) -> (i32, i32, i32) {
    %c0_i32 = arith.constant 0 : i32
    %c0_i32_0 = arith.constant 0 : i32
    return %arg0, %c0_i32, %arg1 : i32, i32, i32
  }
  func.func @transform_1(%arg0: i32, %arg1: i32) -> (i32, i32) {
    %c0_i32 = arith.constant 0 : i32
    %c0_i32_0 = arith.constant 0 : i32
    %c0_i32_1 = arith.constant 0 : i32
    return %c0_i32, %c0_i32_0 : i32, i32
  }
  func.func @transform_2(%arg0: i32, %arg1: i32) -> (i32, i32) {
    %c0_i32 = arith.constant 0 : i32
    %c0_i32_0 = arith.constant 0 : i32
    %c0_i32_1 = arith.constant 0 : i32
    return %c0_i32, %c0_i32_0 : i32, i32
  }
  func.func @transform_3(%arg0: i32, %arg1: i32) -> (i32, i32, i32) {
    %c0_i32 = arith.constant 0 : i32
    %c0_i32_0 = arith.constant 0 : i32
    return %arg0, %c0_i32, %arg1 : i32, i32, i32
  }
}

</mosaic_0001>

<bundles_post_ra>
// kernel: tpu_custom_call.1
= control target key start
LH: loop header
LB: loop body
LE: loop exit
PB: predicated region body
PF: predicated region fallthrough
CT: control target
= control target key end

     0   :  { %8 = vsyncpa [#allocation3], 0  ;;  %s869_s0 = inlined_call_operand.hbm [shape: f32[2,32,256], index: 0, kind: input, shape index: {}]   ;;  %s870_s1 = inlined_call_operand.vmem [shape: f32[11,32], index: 1, kind: input, shape index: {}]   ;;  %s871_s2 = inlined_call_operand.vmem [shape: f32[11,1], index: 2, kind: input, shape index: {}]   ;;  %s872_s3 = inlined_call_operand.vmem [shape: f32[2,11,256], index: 3, kind: output, shape index: {}]  }
   0x1   :  { %10 = vsyncpa [#allocation3 + $0x1], 0  ;;  %s701_s12 = smov 0   ;;  %s703_s13 = smov 0  }
   0x2   :  { %s705_s14 = smov 0   ;;  %s707_s15 = smov 0  }
   0x3   :  { %s709_s16 = smov 0   ;;  %s711_s17 = smov 0  }
   0x4 LB: > { %s489_s18 = sadd.s32 4294967295, %s674_s17   ;;  %s28_s19 = sadd.s32 1, %s670_s16  ;;  %s674_s17 = sphi %s711_s17, %s16_s17   ;;  %s670_s16 = sphi %s709_s16, %s880_s16   ;;  %s666_s15 = sphi %s707_s15, %s879_s15   ;;  %s662_s14 = sphi %s705_s14, %s878_s14   ;;  %s658_s13 = sphi %s703_s13, %s877_s13   ;;  %s654_s12 = sphi %s701_s12, %s876_s12  }
   0x5   : > { %p30_p0 = scmp.ge.s32.totalorder %s28_s19, 2  ;;  %s37_s20 = sadd.s32 1, %s662_s14 }
   0x6   : > { %p44_p1 = scmp.ne.s32.totalorder %s662_s14, %s658_s13  ;;  %p45_p2 = scmp.eq.s32.totalorder %s674_s17, 0 }
   0x7   : > { %s882_s19 = smov (%p30_p0, %s28_s19), 0  ;;  %p50_p4 = scmp.ne.s32.totalorder %s658_s13, %s654_s12 }
   0x8   : > { %p737_p3 = por %p45_p2, %p44_p1  ;;  %s32_s22 = ssub.s32 %s670_s16, %s882_s19 }
   0x9   : > { %p51_p5 = scmp.eq.s32.totalorder %s489_s18, 0  ;;  %p35_p6 = scmp.eq.s32.totalorder %s32_s22, 0 }
   0xa   : > { %p524_p8 = scmp.lt.s32.totalorder %s674_s17, 2  ;;  %s150_s25 = sand.u32 1, %s662_s14  }
   0xb   : > { %p744_p7 = por %p51_p5, %p50_p4  ;;  %s504_s26 = sshll.u32 %s670_s16, 10 }
   0xc   : > { %s750_s24 = scalar_select %p35_p6, %s662_s14, %s37_s20  }
   0xd   : > { %s493_s27 = sshll.u32 %s150_s25, 6  ;;  %s757_s30 = scalar_lea.hbm %s869_s0, %s504_s26 }
   0xe   : > { %s154_s4 = scalar_lea.vmem [#allocation2], %s493_s27  ;;  %p761_p9 = pnand %p524_p8, %p737_p3 }
   0xf   : > { %s163_s5 = sshll.u32 %s154_s4, 4  ;;  %s767_s7 = scalar_lea.sflag [#allocation3], %s150_s25  ;;  %s765_s5 = int_to_ptr.vmem [resolvable:$true] %s163_s5 }
  0x10   : > { %s594_s8 = scalar_lea.hbm %s757_s30, 1024  ;;  %p596_p11 = pneg %p761_p9 }
  0x11   : > { %p595_p10 = scmp.ne.s32.totalorder %s757_s30, %s594_s8  ;;  %s599_s11 = scalar_lea.hbm %s869_s0, 2048 }
  0x12   : > { %p600_p0 = scmp.lt.u32.totalorder %s757_s30, %s869_s0  ;;  %p601_p1 = scmp.lt.u32.totalorder %s599_s11, %s594_s8 }
  0x13   : > { %p597_p12 = pnand %p596_p11, %p595_p10  ;;  %p603_p3 = scmp.lt.u32.totalorder %s594_s8, %s757_s30 }
  0x14   : > { %p602_p2 = por %p601_p1, %p600_p0 }
  0x15   : > { %p598_p13 = pneg %p597_p12 }
  0x16   : > { %p604_p4 = por %p603_p3, %p602_p2 }
  0x18   : > { %p605_p5 = pnand %p604_p4, %p598_p13 }
  0x1a   : > { %608 = shalt.err (!%p605_p5)
}
  0x1b   : > { %s609_s20 = scalar_lea.vmem %s765_s5, 1024  ;;  %s676_s21 = smov [#allocation2]  }
  0x1c   : > { %p610_p6 = scmp.ne.s32.totalorder %s765_s5, %s609_s20  ;;  %s614_s22 = sshll.u32 %s676_s21, 4  ;;  %s615_s22 = int_to_ptr.vmem [resolvable:$false] %s614_s22 }
  0x1d   : > { %s616_s25 = scalar_lea.vmem %s615_s22, 2048  ;;  %p617_p12 = scmp.lt.s32.totalorder %s765_s5, %s615_s22 }
  0x1e   : > { %p612_p8 = pnand %p610_p6, %p596_p11  ;;  %p618_p0 = scmp.lt.s32.totalorder %s616_s25, %s609_s20 }
  0x20   : > { %p613_p10 = pneg %p612_p8  ;;  %p619_p1 = por %p618_p0, %p617_p12 }
  0x22   : > { %p620_p2 = pnand %p619_p1, %p613_p10 }
  0x24   : > { %623 = shalt.err (!%p620_p2)
}
  0x25   : > { %s677_s26 = smov 256   ;;  %s678_s27 = smov 16  }
  0x26   : > { %523 = dma.hbm_to_vmem [thread:$0]  (!%p761_p9), %s757_s30, 1024, %s765_s5, %s767_s7, %s677_s26, %s677_s26, %s678_s27  }
  0x27   : > { %p496_p11 = scmp.ge.s32.totalorder %s674_s17, 1  ;;  %p171_p13 = scmp.lt.s32.totalorder %s674_s17, 3 }
  0x29   : > { %p172_p3 = pnand %p496_p11, %p171_p13 }
  0x2a   : > { %s177_s28 = sand.u32 (!%p172_p3), 1, %s658_s13  }
  0x2b   : > { %175 = sbr.rel (%p172_p3) target bundleno = 316 (0x13c), region = 32  ;;  %s497_s29 = sshll.u32 (!%p172_p3), %s177_s28, 6 }
  0x2c   : > { %s178_s4 = scalar_lea.sflag (!%p172_p3), [#allocation3], %s177_s28  ;;  %s181_s8 = scalar_lea.vmem (!%p172_p3), [#allocation2], %s497_s29 }
  0x32   : > { %649 = dma.done.wait (%p744_p7), %s178_s4, 1024  }
  0x33   : > { %651 = vsyncadd (%p744_p7), %s178_s4, 4294966272  ;;  %v679_v0 = vmov 0.0   ;;  %v680_v1 = vmov 0   ;;  %v224_v2 = vld [vmem:[%s181_s8 + $0x8] sm:$0xff]  ;;  %v226_v3 = vld [vmem:[%s181_s8 + $0x18] sm:$0xff]  ;;  %vm241_vm0 = vcmask 261120  }
  0x34   : > { %312 = vmatprep.mubr.f32.mxu0 %v679_v0  ;;  %318 = vmatprep.mubr.f32.mxu1 %v679_v0  ;;  %v223_v4 = vld [vmem:[%s181_s8] sm:$0xff]  ;;  %v506_v5 = vpack.c.bf16 %v226_v3, %v224_v2  ;;  %v225_v6 = vld [vmem:[%s181_s8 + $0x10] sm:$0xff]  ;;  %v228_v7 = vld [vmem:[%s181_s8 + $0x28] sm:$0xff]  ;;  %p210_p7 = scmp.lt.s32.totalorder %s666_s15, 1 }
  0x35   : > { %577 = vset.pattern.permute.xlu0 %v680_v1  ;;  %v230_v8 = vld [vmem:[%s181_s8 + $0x38] sm:$0xff]  ;;  %v508_v9 = vpack.c.bf16 %v225_v6, %v223_v4  ;;  %v227_v11 = vld [vmem:[%s181_s8 + $0x20] sm:$0xff]  ;;  %v229_v12 = vld [vmem:[%s181_s8 + $0x30] sm:$0xff] }
  0x36   : > { %v510_v10 = vpack.c.bf16 %v230_v8, %v228_v7  ;;  %507 = vmatprep.subr.bf16.mxu0 %v506_v5  ;;  %514 = vmatprep.subr.bf16.mxu1 %v506_v5  ;;  %v221_v13 = vld [vmem:[%s871_s2] sm:$0xff]  ;;  %v512_v14 = vpack.c.bf16 %v229_v12, %v227_v11  ;;  %v222_v15 = vld [vmem:[%s871_s2 + $0x8] sm:$0x7]  ;;  %s884_s15 = smov (!%p210_p7, %s666_s15), 1 }
  0x37   : > { %509 = vmatpush1.bf16.msra.mxu0 %v508_v9  ;;  %516 = vmatpush1.bf16.msra.mxu1 %v508_v9  ;;  %v219_v16 = vld [vmem:[%s870_s1] sm:$0xff]  ;;  %v220_v17 = vld [vmem:[%s870_s1 + $0x8] sm:$0x7]  ;;  %s505_s12 = sshll.u32 %s884_s15, 5 }
  0x38   : > { %511 = vmatprep.subr.bf16.mxu0 %v510_v10  ;;  %515 = vmatprep.subr.bf16.mxu1 %v510_v10  ;;  %s217_s21 = scalar_lea.vmem %s872_s3, %s505_s12 }
  0x39   : > { %233 = vperm.xlu0 %577, %v221_v13  }
  0x3b   : > { %513 = vmatpush1.bf16.msra.mxu0 %v512_v14  ;;  %517 = vmatpush1.bf16.msra.mxu1 %v512_v14 }
  0x3d   : > { %238 = vperm.xlu0 %577, %v222_v15  }
  0x3e   : > { %500 = vmatmul.mubr.msk.f32.vlgmr.msra.gmra.mrb[0].mxu0 %vm241_vm0, %v219_v16  ;;  %501 = vmatmul.mubr.msk.f32.vlgmr.msra.gmra.mrb[0].mxu1 %vm241_vm0, %v220_v17 }
  0xb8   : > { %v234_v18 = vpop.permute.xlu0 %233 }
  0xbc   : > { %v239_v19 = vpop.permute.xlu0 %238 }
 0x111   : > { %v314_v20 = vpop.f32.mrb[0].mxu0  ;;  %v320_v21 = vpop.f32.mrb[0].mxu1 }
 0x112   : > { %v814_v22 = vadd.f32 %v314_v20, %v234_v18  ;;  %v816_v23 = vadd.f32 %v320_v21, %v239_v19  ;;  %v316_v24 = vpop.f32.mrb[1].mxu0  ;;  %v322_v25 = vpop.f32.mrb[1].mxu1 }
 0x113   : > { %v818_v26 = vadd.f32 %v316_v24, %v234_v18  ;;  %v820_v27 = vadd.f32 %v322_v25, %v239_v19 }
 0x114   : > { %v823_v28 = vmul.f32 1.5, %v814_v22  ;;  %v826_v29 = vmul.f32 1.5, %v816_v23 }
 0x115   : > { %v829_v30 = vmul.f32 1.5, %v818_v26  ;;  %v832_v31 = vmul.f32 1.5, %v820_v27 }
 0x116   : > { %v333_v32 = vmin.f32 %v823_v28, 20.0  ;;  %v335_v33 = vmin.f32 %v826_v29, 20.0  ;;  %vm329_vm3 = vcmp.gt.f32.partialorder %v823_v28, 20.0  ;;  %vm331_vm5 = vcmp.gt.f32.partialorder %v826_v29, 20.0 }
 0x117   : > { %v334_v34 = vmin.f32 %v829_v30, 20.0  ;;  %v336_v35 = vmin.f32 %v832_v31, 20.0  ;;  %vm330_vm7 = vcmp.gt.f32.partialorder %v829_v30, 20.0  ;;  %vm332_vm8 = vcmp.gt.f32.partialorder %v832_v31, 20.0 }
 0x118   : > { %v337_v36 = vmul.f32 1.442695, %v333_v32  ;;  %v341_v37 = vmul.f32 1.442695, %v335_v33 }
 0x119   : > { %v339_v38 = vmul.f32 1.442695, %v334_v34  ;;  %v343_v39 = vmul.f32 1.442695, %v336_v35 }
 0x11a   : > { %578 = vpow2.f32 %v337_v36 }
 0x11b   : > { %580 = vpow2.f32 %v341_v37 }
 0x11c   : > { %582 = vpow2.f32 %v339_v38 }
 0x11d   : > { %584 = vpow2.f32 %v343_v39 }
 0x124   : > { %v579_v40 = vpop.eup %578 }
 0x125   : > { %v581_v41 = vpop.eup %580  ;;  %v345_v42 = vadd.f32 1.0, %v579_v40  ;;  %v348_v48 = vmul.f32 -0.5, %v579_v40  ;;  %v351_v53 = vand.u32 2147483647, %v579_v40 }
 0x126   : > { %v583_v43 = vpop.eup %582  ;;  %v363_v44 = vadd.f32 1.0, %v581_v41  ;;  %v366_v49 = vmul.f32 -0.5, %v581_v41  ;;  %v369_v55 = vand.u32 2147483647, %v581_v41 }
 0x127   : > { %v585_v45 = vpop.eup %584  ;;  %586 = vlog2.f32 %v345_v42  ;;  %v354_v46 = vadd.f32 1.0, %v583_v43  ;;  %v357_v50 = vmul.f32 -0.5, %v583_v43  ;;  %v349_v51 = vadd.f32 1.0, %v348_v48 }
 0x128   : > { %588 = vlog2.f32 %v363_v44  ;;  %v372_v47 = vadd.f32 1.0, %v585_v45  ;;  %v375_v52 = vmul.f32 -0.5, %v585_v45  ;;  %v367_v54 = vadd.f32 1.0, %v366_v49 }
 0x129   : > { %590 = vlog2.f32 %v354_v46  ;;  %v358_v56 = vadd.f32 1.0, %v357_v50  ;;  %v360_v58 = vand.u32 2147483647, %v583_v43  ;;  %v350_v61 = vmul.f32 %v579_v40, %v349_v51 }
 0x12a   : > { %592 = vlog2.f32 %v372_v47  ;;  %v376_v62 = vadd.f32 1.0, %v375_v52  ;;  %vm352_vm1 = vcmp.lt.f32.partialorder %v351_v53, 0.0004427343  ;;  %v368_v1 = vmul.f32 %v581_v41, %v367_v54 }
 0x12b   : > { %v378_v2 = vand.u32 2147483647, %v585_v45  ;;  %vm370_vm2 = vcmp.lt.f32.partialorder %v369_v55, 0.0004427343  ;;  %v359_v5 = vmul.f32 %v583_v43, %v358_v56  ;;  %vm361_vm4 = vcmp.lt.f32.partialorder %v360_v58, 0.0004427343 }
 0x12c   : > { %v377_v12 = vmul.f32 %v585_v45, %v376_v62 }
 0x12d   : > { %vm379_vm6 = vcmp.lt.f32.partialorder %v378_v2, 0.0004427343 }
 0x131   : > { %v587_v57 = vpop.eup %586 }
 0x132   : > { %v589_v59 = vpop.eup %588  ;;  %v347_v60 = vmul.f32 0.6931472, %v587_v57 }
 0x133   : > { %v591_v63 = vpop.eup %590  ;;  %v365_v0 = vmul.f32 0.6931472, %v589_v59 }
 0x134   : > { %v353_v3 = vsel %vm352_vm1, %v350_v61, %v347_v60  ;;  %v356_v4 = vmul.f32 0.6931472, %v591_v63  ;;  %v593_v6 = vpop.eup %592 }
 0x135   : > { %v382_v7 = vmul.f32 0.6666667, %v353_v3  ;;  %v371_v8 = vsel %vm370_vm2, %v368_v1, %v365_v0  ;;  %v374_v11 = vmul.f32 0.6931472, %v593_v6 }
 0x136   : > { %v384_v9 = vmul.f32 0.6666667, %v371_v8  ;;  %v362_v10 = vsel %vm361_vm4, %v359_v5, %v356_v4 }
 0x137   : > { %v386_v13 = vsel %vm329_vm3, %v814_v22, %v382_v7  ;;  %v383_v14 = vmul.f32 0.6666667, %v362_v10  ;;  %v380_v16 = vsel %vm379_vm6, %v377_v12, %v374_v11 }
 0x138   : > { %390 = vst [vmem:[%s217_s21] sm:$0xff] %v386_v13  ;;  %v388_v15 = vsel %vm331_vm5, %v816_v23, %v384_v9  ;;  %v385_v18 = vmul.f32 0.6666667, %v380_v16 }
 0x139   : > { %392 = vst [vmem:[%s217_s21 + $0x10] sm:$0x7] %v388_v15  ;;  %v387_v17 = vsel %vm330_vm7, %v818_v26, %v383_v14 }
 0x13a   : > { %391 = vst [vmem:[%s217_s21 + $0x8] sm:$0xff] %v387_v17  ;;  %v389_v19 = vsel %vm332_vm8, %v820_v27, %v385_v18 }
 0x13b   : > { %393 = vst [vmem:[%s217_s21 + $0x18] sm:$0x7] %v389_v19 }
 0x13c PF: > { %s16_s17 = sadd.s32 1, %s674_s17   ;;  %s876_s12 = smov %s658_s13 }
 0x13d   : > { %p13_p9 = scmp.ge.s32.totalorder %s16_s17, 4   ;;  %s877_s13 = smov %s662_s14 }
 0x13e   : > { %s878_s14 = smov %s750_s24  ;;  %s879_s15 = smov %s670_s16 }
 0x13f   : > { %s880_s16 = smov %s882_s19  ;;  %15 = sbr.rel (!%p13_p9) target bundleno = 4 (0x4), region = 72 }
 0x146   :  { %424 = vsyncpa [#allocation3], 1 }
 0x147   :  { %426 = vsyncpa [#allocation3 + $0x1], 1 }

</bundles_post_ra>
